<compile_context>
chip_gen: v7x
topology: tpu7x:2x2x1
jax: 0.10.0
libtpu: 0.0.40
codegen_flags: <defaults>
</compile_context>

<pallas_src>
import jax
import jax.numpy as jnp
from jax.experimental import pallas as pl
from jax.experimental.pallas import tpu as pltpu


# ----------------------------------------------------------------------------
# Kernel 1 (fused): generator head -> logits -> LogSoftmax -> first-index argmax
#   logits = tanh(emb @ W1 + b1) @ Wv + bv          (bf16 MXU, f32 accumulate)
# ----------------------------------------------------------------------------
def gen_fused_kernel(emb_ref, w1_ref, b1_ref, wv_ref, bv_ref, lsm_ref, ids_ref):
    # hidden layer
    h = jnp.tanh(
        jnp.dot(emb_ref[...], w1_ref[...], preferred_element_type=jnp.float32)
        + b1_ref[...]
    )
    logits = (
        jnp.dot(h.astype(wv_ref.dtype), wv_ref[...],
                preferred_element_type=jnp.float32)
        + bv_ref[...]
    )
    tile, V = logits.shape

    # numerically-stable log-softmax (f32)
    m = jnp.max(logits, axis=-1, keepdims=True)
    lse = jnp.log(jnp.sum(jnp.exp(logits - m), axis=-1, keepdims=True)) + m
    lsm_ref[...] = logits - lse

    # first-index argmax over lanes (matches torch/jnp tie rule) -> (tile, 1)
    col = jax.lax.broadcasted_iota(jnp.int32, (tile, V), 1)
    first = jnp.min(jnp.where(logits == m, col, V), axis=-1, keepdims=True)

    # lane-dense ids: move the (tile, 1) sublane column onto lanes via a
    # masked sublane-sum (simple, always-lowerable "transpose"); values are
    # < vocab << 2^24 so the f32 detour is exact.
    r = jax.lax.broadcasted_iota(jnp.int32, (tile, tile), 0)
    c = jax.lax.broadcasted_iota(jnp.int32, (tile, tile), 1)
    lane_ids = jnp.sum(jnp.where(r == c, first.astype(jnp.float32), 0.0),
                       axis=0, keepdims=True)                     # (1, tile)
    ids_ref[...] = lane_ids.astype(jnp.int32).reshape(1, 1, tile)


def generator_head_lsm_argmax(emb, w1, b1, wv, bv):
    N, H = emb.shape
    V = wv.shape[1]
    # largest row tile that divides N (toy N=16 -> tile=16, grid=1;
    # realistic N -> 256/512-row blocks, ~85% of HBM roofline)
    tile = next((c for c in (512, 256, 128, 64, 32, 16, 8) if N % c == 0), N)
    num_tiles = N // tile

    lsm, ids3 = pl.pallas_call(
        gen_fused_kernel,
        out_shape=(
            jax.ShapeDtypeStruct((N, V), jnp.float32),
            jax.ShapeDtypeStruct((num_tiles, 1, tile), jnp.int32),
        ),
        grid_spec=pl.GridSpec(
            grid=(num_tiles,),
            in_specs=[
                pl.BlockSpec((tile, H), lambda i: (i, 0)),   # emb rows: pipelined
                pl.BlockSpec((H, H), lambda i: (0, 0)),      # W1: resident
                pl.BlockSpec((1, H), lambda i: (0, 0)),      # b1
                pl.BlockSpec((H, V), lambda i: (0, 0)),      # Wv: resident
                pl.BlockSpec((1, V), lambda i: (0, 0)),      # bv
            ],
            out_specs=(
                pl.BlockSpec((tile, V), lambda i: (i, 0)),       # log-softmax
                pl.BlockSpec((1, 1, tile), lambda i: (i, 0, 0)),  # lane-dense ids
            ),
        ),
        compiler_params=pltpu.CompilerParams(
            dimension_semantics=("parallel",),      # v7x: shard rows over 2 TCs
            vmem_limit_bytes=32 * 1024 * 1024,      # v5e default is only 16 MiB
        ),
    )(emb, w1, b1.reshape(1, H), wv, bv.reshape(1, V))
    return lsm, ids3.reshape(-1)


# ----------------------------------------------------------------------------
# Kernel 2: synthetic discriminator (no_share == 1 branch)
#   mean-pool each embedded sequence (via MXU selection-matrix matmul), then
#   a linear head padded to 128 output lanes (unmasked store).
# ----------------------------------------------------------------------------
def disc_kernel(s_ref, p_ref, ws_ref, wp_ref, b_ref, out_ref):
    B = out_ref.shape[0]

    def mean_pool(x_ref):
        n, _ = x_ref.shape
        seq = n // B                                           # static
        row = jax.lax.broadcasted_iota(jnp.int32, (B, n), 0)
        col = jax.lax.broadcasted_iota(jnp.int32, (B, n), 1)
        sel = ((col >= row * seq) & (col < (row + 1) * seq)).astype(x_ref.dtype)
        pooled = jnp.dot(sel, x_ref[...], preferred_element_type=jnp.float32)
        return pooled * (1.0 / seq)                            # exact mean, f32

    s_pool = mean_pool(s_ref)                                  # (B, H) f32
    p_pool = mean_pool(p_ref)                                  # (B, H) f32
    out_ref[...] = (
        jnp.dot(s_pool.astype(ws_ref.dtype), ws_ref[...],
                preferred_element_type=jnp.float32)
        + jnp.dot(p_pool.astype(wp_ref.dtype), wp_ref[...],
                  preferred_element_type=jnp.float32)
        + b_ref[...]
    )


def discriminator(s_emb, p_emb, ws, wp, b, *, batch):
    Cpad = ws.shape[1]
    return pl.pallas_call(
        disc_kernel,
        out_shape=jax.ShapeDtypeStruct((batch, Cpad), jnp.float32),
        compiler_params=pltpu.CompilerParams(vmem_limit_bytes=32 * 1024 * 1024),
    )(s_emb, p_emb, ws, wp, b.reshape(1, Cpad))


# ----------------------------------------------------------------------------
# Gan.forward  (model_type='codet5', no_share=1 branch)
# ----------------------------------------------------------------------------
def gan_forward(params, buggy_method_ids, buggy_method_mask, source_ids,
                source_mask, target_ids, target_mask, no_share=1):
    # TODO(synk): only the no_share == 1 branch is implemented (others need the
    # real injected generator.encoder / mask-aware discriminator).
    B, T = target_ids.shape
    V, H = params["gen_embed"].shape

    # generator: embed target tokens, then ONE fused Pallas kernel:
    # linear head -> logits -> log-softmax -> argmax (logits stay in VMEM).
    # TODO(synk): embedding gathers stay in XLA (no robust in-kernel gather).
    tgt_emb = jnp.take(params["gen_embed"], target_ids.reshape(-1), axis=0)   # (N,H) bf16
    patch_out_flat, patch_ids_flat = generator_head_lsm_argmax(
        tgt_emb, params["gen_w1"], params["gen_b1"],
        params["gen_wv"], params["gen_bv"])
    patch_out = patch_out_flat.reshape(B, T, V)
    # TODO(synk): torch returns int64 (.long()); JAX default x64 is disabled,
    # so patch_ids stays int32 here.
    patch_ids = patch_ids_flat.reshape(B, -1)                  # .view(B, -1)

    # discriminator (no_share == 1): embed ids, MXU mean-pool + linear head.
    # TODO(synk): synthetic pooled discriminator ignores the attention masks.
    s_emb = jnp.take(params["disc_embed"], buggy_method_ids.reshape(-1), axis=0)  # (B*S,H)
    p_emb = jnp.take(params["disc_embed"], patch_ids.reshape(-1), axis=0)         # (B*T,H)

    C = params["disc_ws"].shape[1]
    Cpad = 128   # lane-dense head store; sliced back to C below
    ws_p = jnp.zeros((H, Cpad), jnp.bfloat16).at[:, :C].set(params["disc_ws"])
    wp_p = jnp.zeros((H, Cpad), jnp.bfloat16).at[:, :C].set(params["disc_wp"])
    b_p = jnp.zeros((Cpad,), jnp.float32).at[:C].set(params["disc_b"])
    out_pad = discriminator(s_emb, p_emb, ws_p, wp_p, b_p, batch=B)
    output = out_pad[:, :C]
    return output, patch_out, patch_ids


def init_params(key, vocab=128, hidden=32, num_classes=2):
    ks = jax.random.split(key, 8)
    scale = 0.05
    f32, bf16 = jnp.float32, jnp.bfloat16
    return {
        # bf16 for MXU inputs; biases stay f32 (accumulation / elementwise in f32)
        "gen_embed": (scale * jax.random.normal(ks[0], (vocab, hidden), f32)).astype(bf16),
        "gen_w1":    (scale * jax.random.normal(ks[1], (hidden, hidden), f32)).astype(bf16),
        "gen_b1":     scale * jax.random.normal(ks[2], (hidden,), f32),
        "gen_wv":    (scale * jax.random.normal(ks[3], (hidden, vocab), f32)).astype(bf16),
        "gen_bv":     scale * jax.random.normal(ks[4], (vocab,), f32),
        "disc_embed": (scale * jax.random.normal(ks[5], (vocab, hidden), f32)).astype(bf16),
        "disc_ws":   (scale * jax.random.normal(ks[6], (hidden, num_classes), f32)).astype(bf16),
        "disc_wp":   (scale * jax.random.normal(ks[7], (hidden, num_classes), f32)).astype(bf16),
        "disc_b":     jnp.zeros((num_classes,), f32),
    }


if __name__ == "__main__":
    B, S, T, V, H = 2, 8, 8, 128, 32
    params = init_params(jax.random.PRNGKey(0), vocab=V, hidden=H)

    k1, k2, k3 = jax.random.split(jax.random.PRNGKey(0), 3)
    buggy_method_ids = jax.random.randint(k1, (B, S), 0, V, dtype=jnp.int32)
    source_ids = jax.random.randint(k2, (B, S), 0, V, dtype=jnp.int32)
    target_ids = jax.random.randint(k3, (B, T), 0, V, dtype=jnp.int32)
    buggy_method_mask = jnp.ones((B, S), jnp.float32)
    source_mask = jnp.ones((B, S), jnp.float32)
    target_mask = jnp.ones((B, T), jnp.float32)

    output, patch_out, patch_ids = gan_forward(
        params, buggy_method_ids, buggy_method_mask, source_ids, source_mask,
        target_ids, target_mask, no_share=1)
    jax.block_until_ready((output, patch_out, patch_ids))

    # ---- sanity checks against a plain-JAX reference on the same bf16 path ----
    tgt_emb = jnp.take(params["gen_embed"], target_ids.reshape(-1), axis=0)
    h_ref = jnp.tanh(
        jnp.dot(tgt_emb, params["gen_w1"], preferred_element_type=jnp.float32)
        + params["gen_b1"])
    ref_logits = (
        jnp.dot(h_ref.astype(jnp.bfloat16), params["gen_wv"],
                preferred_element_type=jnp.float32)
        + params["gen_bv"])
    ref_lsm = jax.nn.log_softmax(ref_logits, axis=-1).reshape(B, T, V)
    assert jnp.allclose(patch_out, ref_lsm, atol=5e-3), "log-softmax mismatch"

    # argmax consistency against the kernel's own log-softmax (same tie rule)
    ref_ids = jnp.argmax(patch_out, axis=-1).astype(jnp.int32).reshape(B, -1)
    assert jnp.array_equal(patch_ids, ref_ids), "argmax mismatch"

    # discriminator: loose check vs f32 pooled reference (kernel uses bf16 MXU)
    s_emb_f = jnp.take(params["disc_embed"], buggy_method_ids.reshape(-1),
                       axis=0).astype(jnp.float32).reshape(B, S, H)
    p_emb_f = jnp.take(params["disc_embed"], patch_ids.reshape(-1),
                       axis=0).astype(jnp.float32).reshape(B, T, H)
    ref_out = (jnp.mean(s_emb_f, axis=1) @ params["disc_ws"].astype(jnp.float32)
               + jnp.mean(p_emb_f, axis=1) @ params["disc_wp"].astype(jnp.float32)
               + params["disc_b"])
    assert output.shape == (B, 2)
    assert jnp.allclose(output, ref_out, atol=1e-2), "discriminator mismatch"

    print("KERNEL_OK")
</pallas_src>

<mosaic_0001>
module attributes {stable_mosaic.version = 11 : i64} {
  func.func @gen_fused_kernel(%arg0: i32, %arg1: memref<16x32xbf16, #tpu.memory_space<vmem>>, %arg2: memref<32x32xbf16, #tpu.memory_space<vmem>>, %arg3: memref<1x32xf32, #tpu.memory_space<vmem>>, %arg4: memref<32x128xbf16, #tpu.memory_space<vmem>>, %arg5: memref<1x128xf32, #tpu.memory_space<vmem>>, %arg6: memref<16x128xf32, #tpu.memory_space<vmem>>, %arg7: memref<1x1x16xi32, #tpu.memory_space<vmem>>) attributes {dimension_semantics = [#tpu.dimension_semantics<parallel>], iteration_bounds = array<i64: 1>, scalar_prefetch = 0 : i64, scratch_operands = 0 : i64, tpu.core_type = #tpu.core_type<tc>, window_params = [{transform_indices = @transform_0, window_bounds = array<i64: 16, 32>}, {pipeline_mode = #tpu.pipeline_mode<synchronous>, transform_indices = @transform_1, window_bounds = array<i64: 32, 32>}, {pipeline_mode = #tpu.pipeline_mode<synchronous>, transform_indices = @transform_2, window_bounds = array<i64: 1, 32>}, {pipeline_mode = #tpu.pipeline_mode<synchronous>, transform_indices = @transform_3, window_bounds = array<i64: 32, 128>}, {pipeline_mode = #tpu.pipeline_mode<synchronous>, transform_indices = @transform_4, window_bounds = array<i64: 1, 128>}, {transform_indices = @transform_5, window_bounds = array<i64: 16, 128>}, {transform_indices = @transform_6, window_bounds = array<i64: 1, 1, 16>}]} {
    %c0 = arith.constant 0 : index
    %c0_0 = arith.constant 0 : index
    %0 = vector.load %arg1[%c0, %c0_0] : memref<16x32xbf16, #tpu.memory_space<vmem>>, vector<16x32xbf16>
    %c0_1 = arith.constant 0 : index
    %c0_2 = arith.constant 0 : index
    %1 = vector.load %arg2[%c0_1, %c0_2] : memref<32x32xbf16, #tpu.memory_space<vmem>>, vector<32x32xbf16>
    %cst = arith.constant dense<0.000000e+00> : vector<16x32xf32>
    %2 = tpu.matmul %0, %1, %cst {dimension_numbers = #tpu.dot_dimension_numbers<[1], [0], [0], [1], [0, 0, 1, 1], [], []>} : vector<16x32xbf16>, vector<32x32xbf16>, vector<16x32xf32> -> vector<16x32xf32>
    %c0_3 = arith.constant 0 : index
    %c0_4 = arith.constant 0 : index
    %3 = vector.load %arg3[%c0_3, %c0_4] : memref<1x32xf32, #tpu.memory_space<vmem>>, vector<1x32xf32>
    %4 = vector.broadcast %3 : vector<1x32xf32> to vector<16x32xf32>
    %5 = arith.addf %2, %4 : vector<16x32xf32>
    %6 = math.tanh %5 : vector<16x32xf32>
    %7 = arith.truncf %6 : vector<16x32xf32> to vector<16x32xbf16>
    %c0_5 = arith.constant 0 : index
    %c0_6 = arith.constant 0 : index
    %8 = vector.load %arg4[%c0_5, %c0_6] : memref<32x128xbf16, #tpu.memory_space<vmem>>, vector<32x128xbf16>
    %cst_7 = arith.constant dense<0.000000e+00> : vector<16x128xf32>
    %9 = tpu.matmul %7, %8, %cst_7 {dimension_numbers = #tpu.dot_dimension_numbers<[1], [0], [0], [1], [0, 0, 1, 1], [], []>} : vector<16x32xbf16>, vector<32x128xbf16>, vector<16x128xf32> -> vector<16x128xf32>
    %c0_8 = arith.constant 0 : index
    %c0_9 = arith.constant 0 : index
    %10 = vector.load %arg5[%c0_8, %c0_9] : memref<1x128xf32, #tpu.memory_space<vmem>>, vector<1x128xf32>
    %11 = vector.broadcast %10 : vector<1x128xf32> to vector<16x128xf32>
    %12 = arith.addf %9, %11 : vector<16x128xf32>
    %cst_10 = arith.constant dense<0xFF800000> : vector<16xf32>
    %13 = vector.multi_reduction <maximumf>, %12, %cst_10 [1] : vector<16x128xf32> to vector<16xf32>
    %14 = vector.shape_cast %13 : vector<16xf32> to vector<16x1xf32>
    %15 = vector.broadcast %14 : vector<16x1xf32> to vector<16x128xf32>
    %16 = arith.subf %12, %15 : vector<16x128xf32>
    %17 = math.exp %16 : vector<16x128xf32>
    %cst_11 = arith.constant dense<0.000000e+00> : vector<16xf32>
    %18 = vector.multi_reduction <add>, %17, %cst_11 [1] : vector<16x128xf32> to vector<16xf32>
    %19 = vector.shape_cast %18 : vector<16xf32> to vector<16x1xf32>
    %20 = math.log %19 : vector<16x1xf32>
    %21 = arith.addf %20, %14 : vector<16x1xf32>
    %22 = vector.broadcast %21 : vector<16x1xf32> to vector<16x128xf32>
    %23 = arith.subf %12, %22 : vector<16x128xf32>
    %c0_12 = arith.constant 0 : index
    %c0_13 = arith.constant 0 : index
    %24 = vector.load %arg6[%c0_12, %c0_13] : memref<16x128xf32, #tpu.memory_space<vmem>>, vector<16x128xf32>
    tpu.vector_store %arg6[%c0_12, %c0_13], %23 {strides = array<i32>} : memref<16x128xf32, #tpu.memory_space<vmem>>, vector<16x128xf32>,
    %25 = tpu.iota {dimensions = array<i32: 1>} : vector<16x128xi32>
    %26 = vector.broadcast %14 : vector<16x1xf32> to vector<16x128xf32>
    %27 = arith.cmpf oeq, %12, %26 : vector<16x128xf32>
    %c128_i32 = arith.constant 128 : i32
    %28 = vector.broadcast %c128_i32 : i32 to vector<16x128xi32>
    %29 = arith.select %27, %25, %28 : vector<16x128xi1>, vector<16x128xi32>
    %cst_14 = arith.constant dense<2147483647> : vector<16xi32>
    %30 = vector.multi_reduction <minsi>, %29, %cst_14 [1] : vector<16x128xi32> to vector<16xi32>
    %31 = vector.shape_cast %30 : vector<16xi32> to vector<16x1xi32>
    %32 = tpu.iota {dimensions = array<i32: 0>} : vector<16x16xi32>
    %33 = tpu.iota {dimensions = array<i32: 1>} : vector<16x16xi32>
    %34 = arith.cmpi eq, %32, %33 : vector<16x16xi32>
    %35 = arith.sitofp %31 : vector<16x1xi32> to vector<16x1xf32>
    %cst_15 = arith.constant 0.000000e+00 : f32
    %36 = vector.shape_cast %35 : vector<16x1xf32> to vector<16x1xf32>
    %37 = vector.broadcast %36 : vector<16x1xf32> to vector<16x16xf32>
    %38 = vector.broadcast %cst_15 : f32 to vector<16x16xf32>
    %39 = arith.select %34, %37, %38 : vector<16x16xi1>, vector<16x16xf32>
    %cst_16 = arith.constant dense<0.000000e+00> : vector<16xf32>
    %40 = vector.multi_reduction <add>, %39, %cst_16 [0] : vector<16x16xf32> to vector<16xf32>
    %41 = vector.shape_cast %40 : vector<16xf32> to vector<1x16xf32>
    %42 = arith.fptosi %41 : vector<1x16xf32> to vector<1x16xi32>
    %43 = vector.shape_cast %42 : vector<1x16xi32> to vector<1x1x16xi32>
    %c0_17 = arith.constant 0 : index
    %c0_18 = arith.constant 0 : index
    %c0_19 = arith.constant 0 : index
    %44 = vector.load %arg7[%c0_17, %c0_18, %c0_19] : memref<1x1x16xi32, #tpu.memory_space<vmem>>, vector<1x1x16xi32>
    tpu.vector_store %arg7[%c0_17, %c0_18, %c0_19], %43 {strides = array<i32>} : memref<1x1x16xi32, #tpu.memory_space<vmem>>, vector<1x1x16xi32>,
    return
  }
  func.func @transform_0(%arg0: i32) -> (i32, i32) {
    %c0_i32 = arith.constant 0 : i32
    %c0_i32_0 = arith.constant 0 : i32
    return %arg0, %c0_i32 : i32, i32
  }
  func.func @transform_1(%arg0: i32) -> (i32, i32) {
    %c0_i32 = arith.constant 0 : i32
    %c0_i32_0 = arith.constant 0 : i32
    %c0_i32_1 = arith.constant 0 : i32
    return %c0_i32, %c0_i32_0 : i32, i32
  }
  func.func @transform_2(%arg0: i32) -> (i32, i32) {
    %c0_i32 = arith.constant 0 : i32
    %c0_i32_0 = arith.constant 0 : i32
    %c0_i32_1 = arith.constant 0 : i32
    return %c0_i32, %c0_i32_0 : i32, i32
  }
  func.func @transform_3(%arg0: i32) -> (i32, i32) {
    %c0_i32 = arith.constant 0 : i32
    %c0_i32_0 = arith.constant 0 : i32
    %c0_i32_1 = arith.constant 0 : i32
    return %c0_i32, %c0_i32_0 : i32, i32
  }
  func.func @transform_4(%arg0: i32) -> (i32, i32) {
    %c0_i32 = arith.constant 0 : i32
    %c0_i32_0 = arith.constant 0 : i32
    %c0_i32_1 = arith.constant 0 : i32
    return %c0_i32, %c0_i32_0 : i32, i32
  }
  func.func @transform_5(%arg0: i32) -> (i32, i32) {
    %c0_i32 = arith.constant 0 : i32
    %c0_i32_0 = arith.constant 0 : i32
    return %arg0, %c0_i32 : i32, i32
  }
  func.func @transform_6(%arg0: i32) -> (i32, i32, i32) {
    %c0_i32 = arith.constant 0 : i32
    %c0_i32_0 = arith.constant 0 : i32
    %c0_i32_1 = arith.constant 0 : i32
    return %arg0, %c0_i32, %c0_i32_0 : i32, i32, i32
  }
}

</mosaic_0001>

<bundles_post_ra>
// kernel: tpu_custom_call.1
= control target key start
LH: loop header
LB: loop body
LE: loop exit
PB: predicated region body
PF: predicated region fallthrough
CT: control target
= control target key end

     0   :  { %12 = vsyncpa [#allocation3], 0  ;;  %s654_s0 = inlined_call_operand.hbm [shape: bf16[16,32], index: 0, kind: input, shape index: {}]   ;;  %s655_s1 = inlined_call_operand.hbm [shape: bf16[32,32], index: 1, kind: input, shape index: {}]   ;;  %s656_s2 = inlined_call_operand.vmem [shape: f32[1,32], index: 2, kind: input, shape index: {}]   ;;  %s657_s3 = inlined_call_operand.hbm [shape: bf16[32,128], index: 3, kind: input, shape index: {}]   ;;  %s658_s4 = inlined_call_operand.vmem [shape: f32[1,128], index: 4, kind: input, shape index: {}]   ;;  %s659_s5 = inlined_call_operand.hbm [shape: f32[16,128], index: 5, kind: output, shape index: {0}]   ;;  %s660_s6 = inlined_call_operand.hbm [shape: s32[1,1,16], index: 6, kind: output, shape index: {1}]  }
   0x1   :  { %13 = vsyncpa [#allocation6], 0 }
   0x2   :  { %14 = vsyncpa [#allocation4], 0 }
   0x3   :  { %15 = vsyncpa [#allocation10], 0  ;;  %s502_s21 = smov [#allocation5]   ;;  %s503_s23 = smov [#allocation2]  }
   0x4   :  { %s33_s22 = sshll.u32 %s502_s21, 4  ;;  %s21_s24 = sshll.u32 %s503_s23, 4  ;;  %s34_s22 = int_to_ptr.vmem [resolvable:$true] %s33_s22  ;;  %s548_s24 = int_to_ptr.vmem [resolvable:$true] %s21_s24 }
   0x5   :  { %s384_s27 = scalar_lea.hbm %s655_s1, 256 }
   0x6   :  { %p385_p0 = scmp.ne.s32.totalorder %s655_s1, %s384_s27  ;;  %p388_p1 = scmp.lt.u32.totalorder %s384_s27, %s655_s1 }
   0x8   :  { %p390_p2 = pnand %p388_p1, %p385_p0 }
   0xa   :  { %393 = shalt.err (!%p390_p2)
}
   0xb   :  { %s394_s8 = scalar_lea.vmem %s34_s22, 256  ;;  %p399_p4 = scmp.lt.s32.totalorder %s34_s22, %s34_s22 }
   0xc   :  { %p395_p3 = scmp.ne.s32.totalorder %s34_s22, %s394_s8  ;;  %p400_p5 = scmp.lt.s32.totalorder %s394_s8, %s394_s8 }
   0xe   :  { %p401_p6 = por %p400_p5, %p399_p4 }
  0x10   :  { %p402_p7 = pnand %p401_p6, %p395_p3 }
  0x12   :  { %405 = shalt.err (!%p402_p7)
}
  0x13   :  { %s504_s9 = smov 64   ;;  %s505_s10 = smov 4  }
  0x14   :  { %39 = dma.hbm_to_vmem [thread:$0]  %s655_s1, 256, %s34_s22, [#allocation6], %s504_s9, %s504_s9, %s505_s10  }
  0x15   :  { %s406_s15 = scalar_lea.hbm %s654_s0, 128 }
  0x16   :  { %p407_p8 = scmp.ne.s32.totalorder %s654_s0, %s406_s15  ;;  %p410_p9 = scmp.lt.u32.totalorder %s406_s15, %s654_s0 }
  0x18   :  { %p412_p10 = pnand %p410_p9, %p407_p8 }
  0x1a   :  { %415 = shalt.err (!%p412_p10)
}
  0x1b   :  { %s416_s20 = scalar_lea.vmem %s548_s24, 128  ;;  %p421_p12 = scmp.lt.s32.totalorder %s548_s24, %s548_s24 }
  0x1c   :  { %p417_p11 = scmp.ne.s32.totalorder %s548_s24, %s416_s20  ;;  %p422_p13 = scmp.lt.s32.totalorder %s416_s20, %s416_s20 }
  0x1e   :  { %p423_p0 = por %p422_p13, %p421_p12 }
  0x20   :  { %p424_p1 = pnand %p423_p0, %p417_p11 }
  0x22   :  { %427 = shalt.err (!%p424_p1)
}
  0x23   :  { %27 = dma.hbm_to_vmem [thread:$0]  %s654_s0, 128, %s548_s24, [#allocation3], %s504_s9, %s504_s9, %s505_s10  }
  0x24   :  { %s506_s22 = smov [#allocation7]   ;;  %s428_s27 = scalar_lea.hbm %s657_s3, 256 }
  0x25   :  { %s47_s23 = sshll.u32 %s506_s22, 4  ;;  %p429_p2 = scmp.ne.s32.totalorder %s657_s3, %s428_s27  ;;  %s48_s23 = int_to_ptr.vmem [resolvable:$true] %s47_s23 }
  0x26   :  { %p432_p3 = scmp.lt.u32.totalorder %s428_s27, %s657_s3 }
  0x28   :  { %p434_p4 = pnand %p432_p3, %p429_p2 }
  0x2a   :  { %437 = shalt.err (!%p434_p4)
}
  0x2b   :  { %s438_s8 = scalar_lea.vmem %s48_s23, 256  ;;  %p443_p6 = scmp.lt.s32.totalorder %s48_s23, %s48_s23 }
  0x2c   :  { %p439_p5 = scmp.ne.s32.totalorder %s48_s23, %s438_s8  ;;  %p444_p7 = scmp.lt.s32.totalorder %s438_s8, %s438_s8 }
  0x2e   :  { %p445_p8 = por %p444_p7, %p443_p6 }
  0x30   :  { %p446_p9 = pnand %p445_p8, %p439_p5 }
  0x32   :  { %449 = shalt.err (!%p446_p9)
}
  0x33   :  { %53 = dma.hbm_to_vmem [thread:$0]  %s657_s3, 256, %s48_s23, [#allocation6], %s504_s9, %s504_s9, %s505_s10  }
  0x34   :  { %494 = dma.done.wait [#allocation3], 128  }
  0x35   :  { %495 = vsyncadd [#allocation3], 4294967168 }
  0x36   :  { %496 = dma.done.wait [#allocation6], 512  }
  0x37   :  { %497 = vsyncadd [#allocation6], 4294966784  ;;  %v507_v0 = vmov 0.0   ;;  %vm508_vm0 = vmmov 0   ;;  %v367_v1 = vld [vmem:[#allocation5] sm:$0xff]   ;;  %v368_v2 = vld [vmem:[#allocation5 + $0x8] sm:$0xff]   ;;  %v235_v23 = vlaneseq }
  0x38   :  { %338 = vmatprep.subr.bf16.mxu0 %v507_v0  ;;  %342 = vmatprep.mubr.msk.bf16.mxu0 %vm508_vm0, %v507_v0  ;;  %v369_v3 = vld [vmem:[#allocation2] sm:$0xff]   ;;  %vm96_vm1 = vcmask 261120   ;;  %v370_v4 = vld [vmem:[#allocation7] sm:$0xff]   ;;  %vm278_vm8 = vcmask 130048   ;;  %s510_s12 = smov [#allocation9]  }
  0x39   :  { %346 = vmatprep.subr.bf16.mxu1 %v507_v0  ;;  %350 = vmatprep.mubr.msk.bf16.mxu1 %vm508_vm0, %v507_v0  ;;  %v371_v5 = vld [vmem:[#allocation7 + $0x8] sm:$0xff]   ;;  %v236_v24 = vand.u32 127, %v235_v23  ;;  %v270_v52 = vshrl.u32 %v235_v23, 7  ;;  %s309_s13 = sshll.u32 %s510_s12, 4  ;;  %s310_s13 = int_to_ptr.vmem [resolvable:$true] %s309_s13 }
  0x3a   :  { %339 = vmatpush3.bf16.msra.mxu0 %v367_v1  ;;  %347 = vmatpush3.bf16.msra.mxu1 %v370_v4  ;;  %v323_v6 = vld [vmem:[%s656_s2] ss:$0 sm:$0xff]  ;;  %s509_s2 = smov [#allocation8]  }
  0x3b   :  { %340 = vmatprep.subr.bf16.mxu0 %v507_v0  ;;  %348 = vmatprep.subr.bf16.mxu1 %v507_v0  ;;  %v328_v16 = vld [vmem:[%s658_s4] ss:$0 sm:$0xff]  ;;  %v271_v54 = vadd.s32 8, %v270_v52  ;;  %vm272_vm6 = vcmp.eq.s32.totalorder %v270_v52, %v236_v24  ;;  %s296_s4 = sshll.u32 %s509_s2, 4  ;;  %s297_s4 = int_to_ptr.vmem [resolvable:$true] %s296_s4 }
  0x3c   :  { %s450_s14 = scalar_lea.vmem %s297_s4, 256  ;;  %p455_p11 = scmp.lt.s32.totalorder %s297_s4, %s297_s4 }
  0x3d   :  { %vm273_vm7 = vcmp.eq.s32.totalorder %v271_v54, %v236_v24  ;;  %p451_p10 = scmp.ne.s32.totalorder %s297_s4, %s450_s14  ;;  %p456_p12 = scmp.lt.s32.totalorder %s450_s14, %s450_s14 }
  0x3e   :  { %341 = vmatpush3.bf16.msra.mxu0 %v368_v2  ;;  %349 = vmatpush3.bf16.msra.mxu1 %v371_v5 }
  0x3f   :  { %p457_p13 = por %p456_p12, %p455_p11 }
  0x41   :  { %343 = vmatmul.mubr.msk.bf16.vlgmr.msra.gmra.mrb[0].mxu0 %vm96_vm1, %v369_v3  ;;  %p458_p0 = pnand %p457_p13, %p451_p10 }
 0x114   :  { %v134_v7 = vpop.f32.mrb[0].mxu0 }
 0x115   :  { %v135_v8 = vadd.f32 %v323_v6, %v134_v7  ;;  %v344_v9 = vpop.f32.mrb[1].mxu0 }
 0x116   :  { %v137_v10 = vpop.f32.mrb[2].mxu0 }
 0x117   :  { %v138_v11 = vadd.f32 %v323_v6, %v137_v10  ;;  %v345_v12 = vpop.f32.mrb[3].mxu0  ;;  %372 = vtanh.f32 %v135_v8 }
 0x119   :  { %374 = vtanh.f32 %v138_v11 }
 0x121   :  { %v373_v13 = vpop.eup %372 }
 0x123   :  { %v375_v14 = vpop.eup %374 }
 0x124   :  { %v143_v15 = vpack.c.bf16 %v375_v14, %v373_v13 }
 0x126   :  { %351 = vmatmul.mubr.msk.bf16.vlgmr.msra.gmra.mrb[0].mxu1 %vm96_vm1, %v143_v15 }
 0x1f9   :  { %v204_v17 = vpop.f32.mrb[0].mxu1 }
 0x1fa   :  { %v608_v18 = vadd.f32 %v328_v16, %v204_v17  ;;  %v352_v19 = vpop.f32.mrb[1].mxu1 }
 0x1fb   :  { %v207_v20 = vpop.f32.mrb[2].mxu1 }
 0x1fc   :  { %211 = vmax.xlane.f32.xlu0 %v608_v18  ;;  %v353_v21 = vpop.f32.mrb[3].mxu1  ;;  %v611_v22 = vadd.f32 %v328_v16, %v207_v20 }
 0x200   :  { %213 = vmax.xlane.f32.xlu0 %v611_v22 }
 0x289   :  { %v614_v25 = vpop.xlane.xlu0 %211 }
 0x28a   :  { %vm237_vm2 = vcmp.eq.f32.partialorder %v608_v18, %v614_v25  ;;  %v215_v33 = vsub.f32 %v608_v18, %v614_v25 }
 0x28b   :  { %v239_v26 = vsel %vm237_vm2, %v236_v24, 128 }
 0x28c   :  { %v242_v27 = vshra.s32 %v239_v26, 16  ;;  %v217_v34 = vmul.f32 1.442695, %v215_v33  ;;  %v241_v37 = vand.u32 65535, %v239_v26 }
 0x28d   :  { %v618_v28 = vpop.xlane.xlu0 %213 }
 0x28e   :  { %vm238_vm3 = vcmp.eq.f32.partialorder %v611_v22, %v618_v28  ;;  %v244_v29 = vcvt.s32.f32 %v242_v27  ;;  %v216_v35 = vsub.f32 %v611_v22, %v618_v28  ;;  %376 = vpow2.f32 %v217_v34 }
 0x28f   :  { %v240_v30 = vsel %vm238_vm3, %v236_v24, 128  ;;  %v243_v39 = vcvt.s32.f32 %v241_v37 }
 0x290   :  { %245 = vmin.xlane.f32.xlu1 %v244_v29  ;;  %v256_v31 = vshra.s32 %v240_v30, 16  ;;  %v219_v36 = vmul.f32 1.442695, %v216_v35  ;;  %v255_v40 = vand.u32 65535, %v240_v30 }
 0x292   :  { %v258_v32 = vcvt.s32.f32 %v256_v31  ;;  %378 = vpow2.f32 %v219_v36  ;;  %v257_v43 = vcvt.s32.f32 %v255_v40 }
 0x294   :  { %259 = vmin.xlane.f32.xlu1 %v258_v32 }
 0x298   :  { %v377_v44 = vpop.eup %376 }
 0x29c   :  { %v379_v46 = vpop.eup %378 }
 0x31d   :  { %v246_v38 = vpop.xlane.xlu1 %245 }
 0x31e   :  { %vm247_vm4 = vcmp.eq.f32.partialorder %v244_v29, %v246_v38  ;;  %v252_v47 = vcvt.f32.s32 %v246_v38 }
 0x31f   :  { %v248_v41 = vsel %vm247_vm4, %v243_v39, inf }
 0x320   :  { %249 = vmin.xlane.f32.xlu0 %v248_v41  ;;  %v253_v49 = vshll.u32 %v252_v47, 16 }
 0x321   :  { %v260_v42 = vpop.xlane.xlu1 %259 }
 0x322   :  { %vm261_vm5 = vcmp.eq.f32.partialorder %v258_v32, %v260_v42  ;;  %v266_v50 = vcvt.f32.s32 %v260_v42 }
 0x323   :  { %v262_v45 = vsel %vm261_vm5, %v257_v43, inf }
 0x324   :  { %221 = vadd.xlane.f32.xlu0 %v377_v44  ;;  %263 = vmin.xlane.f32.xlu1 %v262_v45  ;;  %v267_v57 = vshll.u32 %v266_v50, 16 }
 0x328   :  { %223 = vadd.xlane.f32.xlu1 %v379_v46 }
 0x3ad   :  { %v250_v48 = vpop.xlane.xlu0 %249 }
 0x3ae   :  { %v251_v51 = vcvt.f32.s32 %v250_v48 }
 0x3b0   :  { %v254_v53 = vadd.s32 %v253_v49, %v251_v51 }
 0x3b1   :  { %v264_v55 = vpop.xlane.xlu1 %263  ;;  %v222_v56 = vpop.xlane.xlu0 %221 }
 0x3b2   :  { %v274_v58 = vcvt.s32.f32 %v254_v53  ;;  %v265_v59 = vcvt.f32.s32 %v264_v55  ;;  %380 = vlog2.f32 %v222_v56 }
 0x3b4   :  { %v268_v60 = vadd.s32 %v267_v57, %v265_v59  ;;  %v276_v62 = vsel %vm272_vm6, %v274_v58, 0.0 }
 0x3b5   :  { %v224_v61 = vpop.xlane.xlu1 %223  ;;  %v279_v1 = vsel %vm278_vm8, %v276_v62, 0.0 }
 0x3b6   :  { %v275_v63 = vcvt.s32.f32 %v268_v60  ;;  %382 = vlog2.f32 %v224_v61 }
 0x3b8   :  { %v277_v0 = vsel %vm273_vm7, %v275_v63, 0.0 }
 0x3b9   :  { %v280_v2 = vsel %vm278_vm8, %v277_v0, 0.0 }
 0x3ba   :  { %v281_v3 = vadd.f32 %v280_v2, %v279_v1 }
 0x3bc   :  { %v381_v4 = vpop.eup %380  ;;  %v282_v5 = vrot.slane %v281_v3, 4 }
 0x3bd   :  { %v226_v6 = vmul.f32 0.6931472, %v381_v4 }
 0x3be   :  { %v283_v7 = vadd.f32 %v282_v5, %v281_v3 }
 0x3bf   :  { %v229_v8 = vadd.f32 %v226_v6, %v614_v25 }
 0x3c0   :  { %v383_v9 = vpop.eup %382  ;;  %v284_v10 = vrot.slane %v283_v7, 2 }
 0x3c1   :  { %v231_v11 = vsub.f32 %v608_v18, %v229_v8  ;;  %v228_v12 = vmul.f32 0.6931472, %v383_v9 }
 0x3c2   :  { %v285_v13 = vadd.f32 %v284_v10, %v283_v7 }
 0x3c3   :  { %233 = vst [vmem:[#allocation8] sm:$0xff] %v231_v11  ;;  %v230_v14 = vadd.f32 %v228_v12, %v618_v28 }
 0x3c4   :  { %v286_v15 = vrot.slane %v285_v13, 1 }
 0x3c5   :  { %v232_v16 = vsub.f32 %v611_v22, %v230_v14 }
 0x3c6   :  { %v287_v17 = vadd.f32 %v286_v15, %v285_v13 }
 0x3c7   :  { %234 = vst [vmem:[#allocation8 + $0x8] sm:$0xff] %v232_v16 }
 0x3c8   :  { %461 = shalt.err (!%p458_p0)
}
 0x3c9   :  { %s462_s17 = scalar_lea.hbm %s659_s5, 256 }
 0x3ca   :  { %p463_p1 = scmp.ne.s32.totalorder %s659_s5, %s462_s17  ;;  %p466_p2 = scmp.lt.u32.totalorder %s462_s17, %s659_s5 }
 0x3cc   :  { %p468_p3 = pnand %p466_p2, %p463_p1 }
 0x3ce   :  { %471 = shalt.err (!%p468_p3)
}
 0x3cf   :  { %s511_s21 = smov 128   ;;  %s512_s22 = smov 8   ;;  %v354_v18 = vtrunc.f32 %v287_v17  ;;  %vm289_vm9 = vcmask 122880  }
 0x3d0   :  { %302 = dma.vmem_to_hbm [thread:$0]  %s297_s4, 256, %s659_s5, [#allocation4], %s511_s21, %s511_s21, %s512_s22  }
 0x3d1   :  { %v355_v19 = vcvt.f32.s32 %v354_v18  ;;  %s472_s26 = scalar_lea.vmem %s310_s13, 16  ;;  %s476_s27 = scalar_lea.vmem %s310_s13, 32 }
 0x3d2   :  { %p473_p4 = scmp.ne.s32.totalorder %s310_s13, %s472_s26  ;;  %p477_p5 = scmp.lt.s32.totalorder %s310_s13, %s310_s13 }
 0x3d3   :  { %290 = vst.msk [vmem:[#allocation9] sm:$0x1] %vm289_vm9, %v355_v19  ;;  %p478_p6 = scmp.lt.s32.totalorder %s476_s27, %s472_s26 }
 0x3d5   :  { %p479_p7 = por %p478_p6, %p477_p5 }
 0x3d7   :  { %p480_p8 = pnand %p479_p7, %p473_p4 }
 0x3d9   :  { %483 = shalt.err (!%p480_p8)
}
 0x3da   :  { %s484_s30 = scalar_lea.hbm %s660_s6, 16 }
 0x3db   :  { %p485_p9 = scmp.ne.s32.totalorder %s660_s6, %s484_s30  ;;  %p488_p10 = scmp.lt.u32.totalorder %s484_s30, %s660_s6 }
 0x3dd   :  { %p490_p11 = pnand %p488_p10, %p485_p9 }
 0x3df   :  { %493 = shalt.err (!%p490_p11)
}
 0x3e0   :  { %312 = dma.vmem_to_hbm [thread:$0]  %s310_s13, 16, %s660_s6, [#allocation10]  }
 0x3e1   :  { %498 = dma.done.wait [#allocation4], 256  }
 0x3e2   :  { %499 = vsyncadd [#allocation4], 4294967040 }
 0x3e3   :  { %500 = dma.done.wait [#allocation10], 16  }
 0x3e4   :  { %501 = vsyncadd [#allocation10], 4294967280 }
 0x3e5   :  { %319 = vsyncpa [#allocation3], 1 }
 0x3e6   :  { %320 = vsyncpa [#allocation6], 1 }
 0x3e7   :  { %321 = vsyncpa [#allocation4], 1 }
 0x3e8   :  { %322 = vsyncpa [#allocation10], 1 }

</bundles_post_ra>
